<compile_context>
chip_gen: v5e
topology: v5e:2x2
jax: 0.10.0
libtpu: 0.0.40
codegen_flags: <defaults>
</compile_context>

<pallas_src>
import functools

import jax
import jax.numpy as jnp
from jax import lax
from jax.experimental import pallas as pl
from jax.experimental.pallas import tpu as pltpu

BN_EPS = 1e-5
HALO = 128                      # lane halo appended after every main tile (>= any tap shift)
MAX_TILE = 2048                 # upper bound on the lane-dense output tile
VMEM_RESIDENT_CAP = 24 << 20    # single-pass cap (conservative enough for v7x's 64 MiB VMEM)


def _round_up(v, m):
    return (v + m - 1) // m * m


def _pick_tile(nl):
    # largest multiple of 128 that divides the flattened output axis, capped at MAX_TILE
    for cand in range(min(nl, MAX_TILE), 0, -128):
        if nl % cand == 0:
            return cand
    return 128


# ----------------------------------------------------------------------------
# Kernel: fused conv (one folded MXU contraction per tile) + exact batch-norm
# statistics + BN scale/shift + ReLU.  grid = (n_tiles,); the un-normalized
# activation stays resident in a VMEM f32 scratch, the output is written once.
# ----------------------------------------------------------------------------
def _make_kernel(pairs, tile_l, cout, groups, inv_count):
    def kernel(w_ref, xm_ref, xh_ref, mask_ref, g_ref, b_ref, o_ref, acc_ref):
        # w_ref   : (rows, ntaps*Cin)        bf16 folded weights (resident)
        # xm_ref  : (P, Cin, tile_l)         bf16 main input tile (pipelined)
        # xh_ref  : (P, Cin, HALO)           bf16 next-128-lane halo view of the same array
        # mask_ref: (groups, nl)             f32 per-column validity mask (resident)
        # g_ref/b_ref: (Cout, 1)             f32 BN gamma / beta
        # o_ref   : (rows, nl)               output (full block, single writeback)
        # acc_ref : (rows, nl)               f32 VMEM scratch (un-normalized activation)
        t = pl.program_id(0)

        # ---- conv tile: assemble the (ntaps*Cin, tile) operand from static shifted
        # ---- slices of the window, then one MXU contraction -------------------------
        win = jnp.concatenate([xm_ref[...], xh_ref[...]], axis=-1)   # (P, Cin, tile+HALO)
        rhs = jnp.concatenate([win[p, :, q:q + tile_l] for (p, q) in pairs], axis=0)
        acc = jnp.dot(w_ref[...], rhs, preferred_element_type=jnp.float32)  # (rows, tile)

        # ---- zero padded / out-of-range columns so BN statistics stay exact ---------
        off = pl.multiple_of(t * tile_l, tile_l)
        mt = mask_ref[:, pl.ds(off, tile_l)]                          # (groups, tile)
        if groups == 1:
            acc = acc * mt
        else:
            acc = jnp.concatenate(
                [acc[g * cout:(g + 1) * cout, :] * mt[g:g + 1, :] for g in range(groups)],
                axis=0)
        acc_ref[:, pl.ds(off, tile_l)] = acc

        # ---- last tile: exact (two-pass) batch stats, folded BN + ReLU, single store -
        @pl.when(t == pl.num_programs(0) - 1)
        def _finalize():
            y = acc_ref[...]                                          # (rows, nl) f32
            mean = jnp.zeros((cout, 1), jnp.float32)
            for g in range(groups):
                mean = mean + jnp.sum(y[g * cout:(g + 1) * cout, :], axis=1, keepdims=True)
            mean = mean * inv_count
            var = jnp.zeros((cout, 1), jnp.float32)
            for g in range(groups):
                d = (y[g * cout:(g + 1) * cout, :] - mean) * mask_ref[g:g + 1, :]
                var = var + jnp.sum(d * d, axis=1, keepdims=True)
            var = var * inv_count
            scale = g_ref[...] * lax.rsqrt(var + BN_EPS)              # (Cout, 1)
            shift = b_ref[...] - mean * scale
            if groups > 1:
                scale = jnp.concatenate([scale] * groups, axis=0)     # (rows, 1)
                shift = jnp.concatenate([shift] * groups, axis=0)
            o_ref[...] = jnp.maximum(y * scale + shift, 0.0).astype(o_ref.dtype)

    return kernel


def _fused_conv_bn_relu(lhs, xflat, mask, gamma, beta, *, pairs, cout, groups,
                        nl, count, out_dtype):
    rows, k_fold = lhs.shape
    p_in, cin, _ = xflat.shape
    tile_l = _pick_tile(nl)
    n_tiles = nl // tile_l

    out_bytes = jnp.dtype(out_dtype).itemsize
    resident = rows * nl * 4 + rows * nl * out_bytes + groups * nl * 4
    assert resident <= VMEM_RESIDENT_CAP, (
        "activation too large for the single-pass VMEM-resident kernel; "
        "TODO(synk): streaming two-phase fallback")

    est = (2 * (lhs.size * lhs.dtype.itemsize
                + p_in * cin * (tile_l + HALO) * xflat.dtype.itemsize
                + 2 * cout * 4)
           + resident)
    vmem_limit = int(min(max(2 * est + (4 << 20), 16 << 20), 48 << 20))

    kernel = _make_kernel(pairs, tile_l, cout, groups, 1.0 / float(count))

    return pl.pallas_call(
        kernel,
        out_shape=jax.ShapeDtypeStruct((rows, nl), out_dtype),
        grid_spec=pltpu.PrefetchScalarGridSpec(
            num_scalar_prefetch=0,
            grid=(n_tiles,),
            in_specs=[
                # folded weights: constant block, resident across the grid
                pl.BlockSpec((rows, k_fold), lambda t: (0, 0)),
                # main input tile: pipelined / double-buffered
                pl.BlockSpec((p_in, cin, tile_l), lambda t: (0, 0, t)),
                # 128-lane halo: second view of the SAME un-duplicated array
                pl.BlockSpec((p_in, cin, HALO),
                             lambda t: (0, 0, (t + 1) * (tile_l // HALO))),
                # validity mask + BN affine params: tiny, resident
                pl.BlockSpec((groups, nl), lambda t: (0, 0)),
                pl.BlockSpec((cout, 1), lambda t: (0, 0)),
                pl.BlockSpec((cout, 1), lambda t: (0, 0)),
            ],
            # full output block with a constant index map -> single HBM writeback
            out_specs=pl.BlockSpec((rows, nl), lambda t: (0, 0)),
            scratch_shapes=[pltpu.VMEM((rows, nl), jnp.float32)],
        ),
        compiler_params=pltpu.CompilerParams(
            # streaming stats carry across tiles -> sequential grid.
            # TODO(synk): per-core partial stats would let this go "parallel" on v7x.
            dimension_semantics=("arbitrary",),
            vmem_limit_bytes=vmem_limit,
        ),
    )(lhs, xflat, xflat, mask, gamma, beta)


# ----------------------------------------------------------------------------
# One ConvOrDeconv layer.  Host work is cheap layout prep only (left pad,
# phase split, folded weight, validity mask) - no im2col, no window copies.
# ----------------------------------------------------------------------------
def conv_or_deconv_layer(a, w, gamma, beta, ks, stride, deconv=False,
                         out_dtype=jnp.float32, compute_dtype=jnp.bfloat16):
    # a: (Cin, N, L) channel-major activations (f32 or bf16)
    cin, n, L = a.shape
    pad = ks // 2
    a = a.astype(compute_dtype)

    if not deconv:
        # nn.Conv1d(cin, cout, ks, stride, padding=ks//2, bias=False); w: (Cout, Cin, ks)
        cout = w.shape[0]
        s = stride
        l_out = (L + 2 * pad - ks) // s + 1
        assert l_out >= 1
        max_q = (ks - 1) // s
        assert max_q < HALO
        l_stride = _round_up(l_out + max_q, 128)         # per-sample padded output length
        nl = n * l_stride
        # left-pad by `pad`, phase-split by stride -> every in-kernel tap is a contiguous
        # lane window (no strided loads)
        buf_len = max(l_stride * s + s, pad + L)
        buf = jnp.zeros((cin, n, buf_len), compute_dtype).at[:, :, pad:pad + L].set(a)
        xflat = jnp.stack([buf[:, :, p::s][:, :, :l_stride] for p in range(s)], axis=0)
        xflat = xflat.reshape(s, cin, nl)
        pairs = [(k % s, k // s) for k in range(ks)]     # (input phase, lane shift) per tap
        lhs = jnp.transpose(w, (0, 2, 1)).reshape(cout, ks * cin)
        groups = 1
        col = jnp.arange(nl, dtype=jnp.int32) % l_stride
        mask = (col < l_out).astype(jnp.float32)[None, :]              # (1, nl)
    else:
        # nn.ConvTranspose1d(cin, cout, ks, stride, padding=ks//2,
        #                    output_padding=stride//2, bias=False); w: (Cin, Cout, ks)
        # Sub-pixel / phase-split transposed conv: output phase r (= j mod stride) is a
        # stride-1 correlation of the UN-dilated input with taps k == (r+pad) (mod stride);
        # all phases come out of one folded matmul as extra output rows.
        cout = w.shape[1]
        s = stride
        out_pad = s // 2
        l_out = (L - 1) * s - 2 * pad + ks + out_pad
        assert l_out >= 1
        infos = []
        for r in range(s):
            rp = (r + pad) % s
            cr = (r + pad) // s
            infos.append((cr, list(range(rp, ks, s))))
        pad_left = max([0] + [len(taps) - 1 - cr for cr, taps in infos])
        d_max = pad_left + max(cr for cr, _ in infos)
        assert d_max < HALO
        lm = -(-l_out // s)                              # per-phase output length (ceil)
        l_stride = _round_up(max(pad_left + L, lm + d_max), 128)
        nl = n * l_stride
        buf = jnp.zeros((cin, n, l_stride), compute_dtype)
        buf = buf.at[:, :, pad_left:pad_left + L].set(a)
        xflat = buf.reshape(cin, nl)[None]               # (1, Cin, nl): single input phase
        pairs = [(0, d) for d in range(d_max + 1)]
        lhs = jnp.zeros((s * cout, (d_max + 1) * cin), jnp.float32)
        for r, (cr, taps) in enumerate(infos):
            for i, k in enumerate(taps):
                d = pad_left + cr - i
                lhs = lhs.at[r * cout:(r + 1) * cout, d * cin:(d + 1) * cin].set(w[:, :, k].T)
        groups = s
        col = jnp.arange(nl, dtype=jnp.int32) % l_stride
        mask = ((col[None, :] * s + jnp.arange(s, dtype=jnp.int32)[:, None]) < l_out
                ).astype(jnp.float32)                    # (s, nl)

    xflat = jnp.pad(xflat, ((0, 0), (0, 0), (0, HALO)))  # halo slack after the last sample
    lhs = lhs.astype(compute_dtype)
    g2 = gamma.reshape(cout, 1).astype(jnp.float32)
    b2 = beta.reshape(cout, 1).astype(jnp.float32)

    y = _fused_conv_bn_relu(lhs, xflat, mask, g2, b2, pairs=pairs, cout=cout,
                            groups=groups, nl=nl, count=n * l_out, out_dtype=out_dtype)

    if not deconv:
        return y.reshape(cout, n, l_stride)[:, :, :l_out]
    # interleave the output phases: out[co, n, m*s + r] = phase_r[co, n, m]
    lm = -(-l_out // stride)
    y = y.reshape(stride, cout, n, l_stride)[:, :, :, :lm]
    y = jnp.transpose(y, (1, 2, 3, 0)).reshape(cout, n, lm * stride)
    return y[:, :, :l_out]


def conv_or_deconv_block(x, params, ks_list, s_list, deconv=False):
    # x: (N, Cin, L) (PyTorch layout).  Activations stay channel-major (C, N, L) between
    # layers; intermediate activations are stored in bf16 (the next layer feeds the MXU in
    # bf16 anyway), the final layer output is f32.
    a = jnp.transpose(x, (1, 0, 2))
    depth = len(ks_list)
    for i, ((w, gamma, beta), ks, s) in enumerate(zip(params, ks_list, s_list)):
        out_dtype = jnp.float32 if i == depth - 1 else jnp.bfloat16
        a = conv_or_deconv_layer(a, w, gamma, beta, ks, s, deconv, out_dtype=out_dtype)
    # TODO(synk): fuse the whole layer stack into one pallas_call with activations resident
    #             in VMEM for these tiny per-layer shapes.
    return jnp.transpose(a, (1, 0, 2))


# ----------------------------------------------------------------------------
# Deterministic parameter construction (matches the module's __init__ shapes)
# ----------------------------------------------------------------------------
def init_block_params(key, ch_in, ch_out_list, ks_list, deconv=False):
    ch_in_list = [ch_in] + ch_out_list[:-1]
    params = []
    for cin, cout, ks in zip(ch_in_list, ch_out_list, ks_list):
        key, sub = jax.random.split(key)
        if not deconv:
            w = 0.1 * jax.random.normal(sub, (cout, cin, ks), jnp.float32)
        else:
            w = 0.1 * jax.random.normal(sub, (cin, cout, ks), jnp.float32)
        gamma = jnp.ones((cout,), jnp.float32)           # PyTorch BN default init
        beta = jnp.zeros((cout,), jnp.float32)
        params.append((w, gamma, beta))
    return params


# ----------------------------------------------------------------------------
# Pure-JAX references.  `quantize=True` mirrors the kernel's precision exactly
# (bf16 layer inputs / weights, bf16 intermediate activation stores, f32 math);
# `quantize=False` is the exact f32 module semantics (looser tolerance).
# ----------------------------------------------------------------------------
def _reference_block(x, params, ks_list, s_list, deconv=False, quantize=False):
    depth = len(ks_list)
    for i, ((w, gamma, beta), ks, s) in enumerate(zip(params, ks_list, s_list)):
        pad = ks // 2
        if quantize:
            xq = x.astype(jnp.bfloat16).astype(jnp.float32)
            wq = w.astype(jnp.bfloat16).astype(jnp.float32)
        else:
            xq, wq = x, w
        if not deconv:
            y = lax.conv_general_dilated(
                xq, wq, window_strides=(s,), padding=[(pad, pad)],
                dimension_numbers=("NCH", "OIH", "NCH"),
                precision=lax.Precision.HIGHEST)
        else:
            out_pad = s // 2
            w_oih = jnp.flip(wq, axis=2).transpose(1, 0, 2)
            y = lax.conv_general_dilated(
                xq, w_oih, window_strides=(1,),
                padding=[(ks - 1 - pad, ks - 1 - pad + out_pad)],
                lhs_dilation=(s,),
                dimension_numbers=("NCH", "OIH", "NCH"),
                precision=lax.Precision.HIGHEST)
        mean = jnp.mean(y, axis=(0, 2), keepdims=True)
        var = jnp.mean((y - mean) ** 2, axis=(0, 2), keepdims=True)
        y = (y - mean) * lax.rsqrt(var + BN_EPS)
        y = y * gamma[None, :, None] + beta[None, :, None]
        y = jnp.maximum(y, 0.0)
        if quantize and i < depth - 1:
            y = y.astype(jnp.bfloat16).astype(jnp.float32)   # mirror bf16 inter-layer store
        x = y
    return x


if __name__ == "__main__":
    key = jax.random.PRNGKey(0)
    k_x, k_conv, k_deconv = jax.random.split(key, 3)

    # Small shapes consistent with the module: batch=2, ch_in=4, seq len=16.
    N, CH_IN, L = 2, 4, 16
    ch_out_list = [8, 16]
    ks_list = [5, 3]
    s_list = [2, 1]

    x = jax.random.normal(k_x, (N, CH_IN, L), jnp.float32)

    # --- Conv block (deconv=False) ---
    conv_params = init_block_params(k_conv, CH_IN, ch_out_list, ks_list, deconv=False)
    conv_fn = jax.jit(functools.partial(
        conv_or_deconv_block, ks_list=ks_list, s_list=s_list, deconv=False))
    out_conv = jax.block_until_ready(conv_fn(x, conv_params))
    assert out_conv.shape == (N, ch_out_list[-1], 8), out_conv.shape
    ref_conv_bf16 = _reference_block(x, conv_params, ks_list, s_list, False, quantize=True)
    ref_conv_f32 = _reference_block(x, conv_params, ks_list, s_list, False, quantize=False)
    assert jnp.allclose(out_conv, ref_conv_bf16, atol=3e-2, rtol=3e-2), \
        float(jnp.max(jnp.abs(out_conv - ref_conv_bf16)))
    assert jnp.allclose(out_conv, ref_conv_f32, atol=1e-1, rtol=1e-1), \
        float(jnp.max(jnp.abs(out_conv - ref_conv_f32)))

    # --- Deconv block (deconv=True, ConvTranspose1d path, sub-pixel) ---
    deconv_params = init_block_params(k_deconv, CH_IN, ch_out_list, ks_list, deconv=True)
    deconv_fn = jax.jit(functools.partial(
        conv_or_deconv_block, ks_list=ks_list, s_list=s_list, deconv=True))
    out_deconv = jax.block_until_ready(deconv_fn(x, deconv_params))
    assert out_deconv.shape == (N, ch_out_list[-1], 32), out_deconv.shape
    ref_dec_bf16 = _reference_block(x, deconv_params, ks_list, s_list, True, quantize=True)
    ref_dec_f32 = _reference_block(x, deconv_params, ks_list, s_list, True, quantize=False)
    assert jnp.allclose(out_deconv, ref_dec_bf16, atol=3e-2, rtol=3e-2), \
        float(jnp.max(jnp.abs(out_deconv - ref_dec_bf16)))
    assert jnp.allclose(out_deconv, ref_dec_f32, atol=1e-1, rtol=1e-1), \
        float(jnp.max(jnp.abs(out_deconv - ref_dec_f32)))

    print("KERNEL_OK")
</pallas_src>

<mosaic_0001>
module attributes {stable_mosaic.version = 11 : i64} {
  func.func @kernel(%arg0: i32, %arg1: memref<8x20xbf16, #tpu.memory_space<vmem>>, %arg2: memref<2x4x256xbf16, #tpu.memory_space<vmem>>, %arg3: memref<2x4x128xbf16, #tpu.memory_space<vmem>>, %arg4: memref<1x256xf32, #tpu.memory_space<vmem>>, %arg5: memref<8x1xf32, #tpu.memory_space<vmem>>, %arg6: memref<8x1xf32, #tpu.memory_space<vmem>>, %arg7: memref<8x256xbf16, #tpu.memory_space<vmem>>, %arg8: memref<8x256xf32, #tpu.memory_space<vmem>>) attributes {dimension_semantics = [#tpu.dimension_semantics<arbitrary>], iteration_bounds = array<i64: 1>, scalar_prefetch = 0 : i64, scratch_operands = 1 : i64, tpu.core_type = #tpu.core_type<tc>, window_params = [{pipeline_mode = #tpu.pipeline_mode<synchronous>, transform_indices = @transform_0, window_bounds = array<i64: 8, 20>}, {transform_indices = @transform_1, window_bounds = array<i64: 2, 4, 256>}, {transform_indices = @transform_2, window_bounds = array<i64: 2, 4, 128>}, {pipeline_mode = #tpu.pipeline_mode<synchronous>, transform_indices = @transform_3, window_bounds = array<i64: 1, 256>}, {pipeline_mode = #tpu.pipeline_mode<synchronous>, transform_indices = @transform_4, window_bounds = array<i64: 8, 1>}, {pipeline_mode = #tpu.pipeline_mode<synchronous>, transform_indices = @transform_5, window_bounds = array<i64: 8, 1>}, {pipeline_mode = #tpu.pipeline_mode<synchronous>, transform_indices = @transform_6, window_bounds = array<i64: 8, 256>}]} {
    %c0 = arith.constant 0 : index
    %c0_0 = arith.constant 0 : index
    %c0_1 = arith.constant 0 : index
    %0 = vector.load %arg2[%c0, %c0_0, %c0_1] : memref<2x4x256xbf16, #tpu.memory_space<vmem>>, vector<2x4x256xbf16>
    %c0_2 = arith.constant 0 : index
    %c0_3 = arith.constant 0 : index
    %c0_4 = arith.constant 0 : index
    %1 = vector.load %arg3[%c0_2, %c0_3, %c0_4] : memref<2x4x128xbf16, #tpu.memory_space<vmem>>, vector<2x4x128xbf16>
    %2 = tpu.concatenate %0, %1 in 2 : vector<2x4x256xbf16>, vector<2x4x128xbf16> -> vector<2x4x384xbf16>
    %3 = vector.extract_strided_slice %2 {offsets = [0, 0, 0], sizes = [1, 4, 256], strides = [1, 1, 1]} : vector<2x4x384xbf16> to vector<1x4x256xbf16>
    %4 = vector.shape_cast %3 : vector<1x4x256xbf16> to vector<4x256xbf16>
    %5 = vector.extract_strided_slice %2 {offsets = [1, 0, 0], sizes = [1, 4, 256], strides = [1, 1, 1]} : vector<2x4x384xbf16> to vector<1x4x256xbf16>
    %6 = vector.shape_cast %5 : vector<1x4x256xbf16> to vector<4x256xbf16>
    %7 = vector.extract_strided_slice %2 {offsets = [0, 0, 1], sizes = [1, 4, 256], strides = [1, 1, 1]} : vector<2x4x384xbf16> to vector<1x4x256xbf16>
    %8 = vector.shape_cast %7 : vector<1x4x256xbf16> to vector<4x256xbf16>
    %9 = vector.extract_strided_slice %2 {offsets = [1, 0, 1], sizes = [1, 4, 256], strides = [1, 1, 1]} : vector<2x4x384xbf16> to vector<1x4x256xbf16>
    %10 = vector.shape_cast %9 : vector<1x4x256xbf16> to vector<4x256xbf16>
    %11 = vector.extract_strided_slice %2 {offsets = [0, 0, 2], sizes = [1, 4, 256], strides = [1, 1, 1]} : vector<2x4x384xbf16> to vector<1x4x256xbf16>
    %12 = vector.shape_cast %11 : vector<1x4x256xbf16> to vector<4x256xbf16>
    %13 = tpu.concatenate %4, %6, %8, %10, %12 in 0 : vector<4x256xbf16>, vector<4x256xbf16>, vector<4x256xbf16>, vector<4x256xbf16>, vector<4x256xbf16> -> vector<20x256xbf16>
    %c0_5 = arith.constant 0 : index
    %c0_6 = arith.constant 0 : index
    %14 = vector.load %arg1[%c0_5, %c0_6] : memref<8x20xbf16, #tpu.memory_space<vmem>>, vector<8x20xbf16>
    %cst = arith.constant dense<0.000000e+00> : vector<8x256xf32>
    %15 = tpu.matmul %14, %13, %cst {dimension_numbers = #tpu.dot_dimension_numbers<[1], [0], [0], [1], [0, 0, 1, 1], [], []>} : vector<8x20xbf16>, vector<20x256xbf16>, vector<8x256xf32> -> vector<8x256xf32>
    %c256_i32 = arith.constant 256 : i32
    %16 = arith.muli %arg0, %c256_i32 : i32
    %17 = tpu.assume_multiple %16, 256 : i32
    %c0_7 = arith.constant 0 : index
    %18 = arith.index_cast %17 : i32 to index
    %19 = vector.load %arg4[%c0_7, %18] : memref<1x256xf32, #tpu.memory_space<vmem>>, vector<1x256xf32>
    %20 = vector.broadcast %19 : vector<1x256xf32> to vector<8x256xf32>
    %21 = arith.mulf %15, %20 : vector<8x256xf32>
    %c0_8 = arith.constant 0 : index
    %22 = arith.index_cast %17 : i32 to index
    %23 = vector.load %arg8[%c0_8, %22] : memref<8x256xf32, #tpu.memory_space<vmem>>, vector<8x256xf32>
    tpu.vector_store %arg8[%c0_8, %22], %21 {strides = array<i32>} : memref<8x256xf32, #tpu.memory_space<vmem>>, vector<8x256xf32>,
    %c0_i32 = arith.constant 0 : i32
    %24 = arith.cmpi eq, %arg0, %c0_i32 : i32
    %25 = arith.extui %24 : i1 to i32
    %c0_i32_9 = arith.constant 0 : i32
    %26 = arith.cmpi ne, %25, %c0_i32_9 : i32
    scf.if %26 {
      %c0_10 = arith.constant 0 : index
      %c0_11 = arith.constant 0 : index
      %27 = vector.load %arg8[%c0_10, %c0_11] : memref<8x256xf32, #tpu.memory_space<vmem>>, vector<8x256xf32>
      %cst_12 = arith.constant 0.000000e+00 : f32
      %28 = vector.broadcast %cst_12 : f32 to vector<8x1xf32>
      %cst_13 = arith.constant dense<0.000000e+00> : vector<8xf32>
      %29 = vector.multi_reduction <add>, %27, %cst_13 [1] : vector<8x256xf32> to vector<8xf32>
      %30 = vector.shape_cast %29 : vector<8xf32> to vector<8x1xf32>
      %31 = arith.addf %28, %30 : vector<8x1xf32>
      %cst_14 = arith.constant 6.250000e-02 : f32
      %32 = vector.broadcast %cst_14 : f32 to vector<8x1xf32>
      %33 = arith.mulf %31, %32 : vector<8x1xf32>
      %cst_15 = arith.constant 0.000000e+00 : f32
      %34 = vector.broadcast %cst_15 : f32 to vector<8x1xf32>
      %35 = vector.broadcast %33 : vector<8x1xf32> to vector<8x256xf32>
      %36 = arith.subf %27, %35 : vector<8x256xf32>
      %c0_16 = arith.constant 0 : index
      %c0_17 = arith.constant 0 : index
      %37 = vector.load %arg4[%c0_16, %c0_17] : memref<1x256xf32, #tpu.memory_space<vmem>>, vector<1x256xf32>
      %38 = vector.broadcast %37 : vector<1x256xf32> to vector<8x256xf32>
      %39 = arith.mulf %36, %38 : vector<8x256xf32>
      %40 = arith.mulf %39, %39 : vector<8x256xf32>
      %cst_18 = arith.constant dense<0.000000e+00> : vector<8xf32>
      %41 = vector.multi_reduction <add>, %40, %cst_18 [1] : vector<8x256xf32> to vector<8xf32>
      %42 = vector.shape_cast %41 : vector<8xf32> to vector<8x1xf32>
      %43 = arith.addf %34, %42 : vector<8x1xf32>
      %cst_19 = arith.constant 6.250000e-02 : f32
      %44 = vector.broadcast %cst_19 : f32 to vector<8x1xf32>
      %45 = arith.mulf %43, %44 : vector<8x1xf32>
      %c0_20 = arith.constant 0 : index
      %c0_21 = arith.constant 0 : index
      %46 = vector.load %arg5[%c0_20, %c0_21] : memref<8x1xf32, #tpu.memory_space<vmem>>, vector<8x1xf32>
      %cst_22 = arith.constant 9.99999974E-6 : f32
      %47 = vector.broadcast %cst_22 : f32 to vector<8x1xf32>
      %48 = arith.addf %45, %47 : vector<8x1xf32>
      %49 = math.rsqrt %48 : vector<8x1xf32>
      %50 = arith.mulf %46, %49 : vector<8x1xf32>
      %c0_23 = arith.constant 0 : index
      %c0_24 = arith.constant 0 : index
      %51 = vector.load %arg6[%c0_23, %c0_24] : memref<8x1xf32, #tpu.memory_space<vmem>>, vector<8x1xf32>
      %52 = arith.mulf %33, %50 : vector<8x1xf32>
      %53 = arith.subf %51, %52 : vector<8x1xf32>
      %54 = vector.broadcast %50 : vector<8x1xf32> to vector<8x256xf32>
      %55 = arith.mulf %27, %54 : vector<8x256xf32>
      %56 = vector.broadcast %53 : vector<8x1xf32> to vector<8x256xf32>
      %57 = arith.addf %55, %56 : vector<8x256xf32>
      %cst_25 = arith.constant 0.000000e+00 : f32
      %58 = vector.broadcast %cst_25 : f32 to vector<8x256xf32>
      %59 = arith.maximumf %57, %58 : vector<8x256xf32>
      %60 = arith.truncf %59 : vector<8x256xf32> to vector<8x256xbf16>
      %c0_26 = arith.constant 0 : index
      %c0_27 = arith.constant 0 : index
      %61 = vector.load %arg7[%c0_26, %c0_27] : memref<8x256xbf16, #tpu.memory_space<vmem>>, vector<8x256xbf16>
      tpu.vector_store %arg7[%c0_26, %c0_27], %60 {strides = array<i32>} : memref<8x256xbf16, #tpu.memory_space<vmem>>, vector<8x256xbf16>,
    } else {
    }
    return
  }
  func.func @transform_0(%arg0: i32) -> (i32, i32) {
    %c0_i32 = arith.constant 0 : i32
    %c0_i32_0 = arith.constant 0 : i32
    %c0_i32_1 = arith.constant 0 : i32
    return %c0_i32, %c0_i32_0 : i32, i32
  }
  func.func @transform_1(%arg0: i32) -> (i32, i32, i32) {
    %c0_i32 = arith.constant 0 : i32
    %c0_i32_0 = arith.constant 0 : i32
    %c0_i32_1 = arith.constant 0 : i32
    return %c0_i32, %c0_i32_0, %arg0 : i32, i32, i32
  }
  func.func @transform_2(%arg0: i32) -> (i32, i32, i32) {
    %c1_i32 = arith.constant 1 : i32
    %0 = arith.addi %arg0, %c1_i32 : i32
    %c2_i32 = arith.constant 2 : i32
    %1 = arith.muli %0, %c2_i32 : i32
    %c0_i32 = arith.constant 0 : i32
    %c0_i32_0 = arith.constant 0 : i32
    %c0_i32_1 = arith.constant 0 : i32
    return %c0_i32, %c0_i32_0, %1 : i32, i32, i32
  }
  func.func @transform_3(%arg0: i32) -> (i32, i32) {
    %c0_i32 = arith.constant 0 : i32
    %c0_i32_0 = arith.constant 0 : i32
    %c0_i32_1 = arith.constant 0 : i32
    return %c0_i32, %c0_i32_0 : i32, i32
  }
  func.func @transform_4(%arg0: i32) -> (i32, i32) {
    %c0_i32 = arith.constant 0 : i32
    %c0_i32_0 = arith.constant 0 : i32
    %c0_i32_1 = arith.constant 0 : i32
    return %c0_i32, %c0_i32_0 : i32, i32
  }
  func.func @transform_5(%arg0: i32) -> (i32, i32) {
    %c0_i32 = arith.constant 0 : i32
    %c0_i32_0 = arith.constant 0 : i32
    %c0_i32_1 = arith.constant 0 : i32
    return %c0_i32, %c0_i32_0 : i32, i32
  }
  func.func @transform_6(%arg0: i32) -> (i32, i32) {
    %c0_i32 = arith.constant 0 : i32
    %c0_i32_0 = arith.constant 0 : i32
    %c0_i32_1 = arith.constant 0 : i32
    return %c0_i32, %c0_i32_0 : i32, i32
  }
}

module attributes {stable_mosaic.version = 11 : i64} {
  func.func @kernel(%arg0: i32, %arg1: memref<16x24xbf16, #tpu.memory_space<vmem>>, %arg2: memref<1x8x256xbf16, #tpu.memory_space<vmem>>, %arg3: memref<1x8x128xbf16, #tpu.memory_space<vmem>>, %arg4: memref<1x256xf32, #tpu.memory_space<vmem>>, %arg5: memref<16x1xf32, #tpu.memory_space<vmem>>, %arg6: memref<16x1xf32, #tpu.memory_space<vmem>>, %arg7: memref<16x256xf32, #tpu.memory_space<vmem>>, %arg8: memref<16x256xf32, #tpu.memory_space<vmem>>) attributes {dimension_semantics = [#tpu.dimension_semantics<arbitrary>], iteration_bounds = array<i64: 1>, scalar_prefetch = 0 : i64, scratch_operands = 1 : i64, tpu.core_type = #tpu.core_type<tc>, window_params = [{pipeline_mode = #tpu.pipeline_mode<synchronous>, transform_indices = @transform_0, window_bounds = array<i64: 16, 24>}, {transform_indices = @transform_1, window_bounds = array<i64: 1, 8, 256>}, {transform_indices = @transform_2, window_bounds = array<i64: 1, 8, 128>}, {pipeline_mode = #tpu.pipeline_mode<synchronous>, transform_indices = @transform_3, window_bounds = array<i64: 1, 256>}, {pipeline_mode = #tpu.pipeline_mode<synchronous>, transform_indices = @transform_4, window_bounds = array<i64: 16, 1>}, {pipeline_mode = #tpu.pipeline_mode<synchronous>, transform_indices = @transform_5, window_bounds = array<i64: 16, 1>}, {pipeline_mode = #tpu.pipeline_mode<synchronous>, transform_indices = @transform_6, window_bounds = array<i64: 16, 256>}]} {
    %c0 = arith.constant 0 : index
    %c0_0 = arith.constant 0 : index
    %c0_1 = arith.constant 0 : index
    %0 = vector.load %arg2[%c0, %c0_0, %c0_1] : memref<1x8x256xbf16, #tpu.memory_space<vmem>>, vector<1x8x256xbf16>
    %c0_2 = arith.constant 0 : index
    %c0_3 = arith.constant 0 : index
    %c0_4 = arith.constant 0 : index
    %1 = vector.load %arg3[%c0_2, %c0_3, %c0_4] : memref<1x8x128xbf16, #tpu.memory_space<vmem>>, vector<1x8x128xbf16>
    %2 = tpu.concatenate %0, %1 in 2 : vector<1x8x256xbf16>, vector<1x8x128xbf16> -> vector<1x8x384xbf16>
    %3 = vector.extract_strided_slice %2 {offsets = [0, 0, 0], sizes = [1, 8, 256], strides = [1, 1, 1]} : vector<1x8x384xbf16> to vector<1x8x256xbf16>
    %4 = vector.shape_cast %3 : vector<1x8x256xbf16> to vector<8x256xbf16>
    %5 = vector.extract_strided_slice %2 {offsets = [0, 0, 1], sizes = [1, 8, 256], strides = [1, 1, 1]} : vector<1x8x384xbf16> to vector<1x8x256xbf16>
    %6 = vector.shape_cast %5 : vector<1x8x256xbf16> to vector<8x256xbf16>
    %7 = vector.extract_strided_slice %2 {offsets = [0, 0, 2], sizes = [1, 8, 256], strides = [1, 1, 1]} : vector<1x8x384xbf16> to vector<1x8x256xbf16>
    %8 = vector.shape_cast %7 : vector<1x8x256xbf16> to vector<8x256xbf16>
    %9 = tpu.concatenate %4, %6, %8 in 0 : vector<8x256xbf16>, vector<8x256xbf16>, vector<8x256xbf16> -> vector<24x256xbf16>
    %c0_5 = arith.constant 0 : index
    %c0_6 = arith.constant 0 : index
    %10 = vector.load %arg1[%c0_5, %c0_6] : memref<16x24xbf16, #tpu.memory_space<vmem>>, vector<16x24xbf16>
    %cst = arith.constant dense<0.000000e+00> : vector<16x256xf32>
    %11 = tpu.matmul %10, %9, %cst {dimension_numbers = #tpu.dot_dimension_numbers<[1], [0], [0], [1], [0, 0, 1, 1], [], []>} : vector<16x24xbf16>, vector<24x256xbf16>, vector<16x256xf32> -> vector<16x256xf32>
    %c256_i32 = arith.constant 256 : i32
    %12 = arith.muli %arg0, %c256_i32 : i32
    %13 = tpu.assume_multiple %12, 256 : i32
    %c0_7 = arith.constant 0 : index
    %14 = arith.index_cast %13 : i32 to index
    %15 = vector.load %arg4[%c0_7, %14] : memref<1x256xf32, #tpu.memory_space<vmem>>, vector<1x256xf32>
    %16 = vector.broadcast %15 : vector<1x256xf32> to vector<16x256xf32>
    %17 = arith.mulf %11, %16 : vector<16x256xf32>
    %c0_8 = arith.constant 0 : index
    %18 = arith.index_cast %13 : i32 to index
    %19 = vector.load %arg8[%c0_8, %18] : memref<16x256xf32, #tpu.memory_space<vmem>>, vector<16x256xf32>
    tpu.vector_store %arg8[%c0_8, %18], %17 {strides = array<i32>} : memref<16x256xf32, #tpu.memory_space<vmem>>, vector<16x256xf32>,
    %c0_i32 = arith.constant 0 : i32
    %20 = arith.cmpi eq, %arg0, %c0_i32 : i32
    %21 = arith.extui %20 : i1 to i32
    %c0_i32_9 = arith.constant 0 : i32
    %22 = arith.cmpi ne, %21, %c0_i32_9 : i32
    scf.if %22 {
      %c0_10 = arith.constant 0 : index
      %c0_11 = arith.constant 0 : index
      %23 = vector.load %arg8[%c0_10, %c0_11] : memref<16x256xf32, #tpu.memory_space<vmem>>, vector<16x256xf32>
      %cst_12 = arith.constant 0.000000e+00 : f32
      %24 = vector.broadcast %cst_12 : f32 to vector<16x1xf32>
      %cst_13 = arith.constant dense<0.000000e+00> : vector<16xf32>
      %25 = vector.multi_reduction <add>, %23, %cst_13 [1] : vector<16x256xf32> to vector<16xf32>
      %26 = vector.shape_cast %25 : vector<16xf32> to vector<16x1xf32>
      %27 = arith.addf %24, %26 : vector<16x1xf32>
      %cst_14 = arith.constant 6.250000e-02 : f32
      %28 = vector.broadcast %cst_14 : f32 to vector<16x1xf32>
      %29 = arith.mulf %27, %28 : vector<16x1xf32>
      %cst_15 = arith.constant 0.000000e+00 : f32
      %30 = vector.broadcast %cst_15 : f32 to vector<16x1xf32>
      %31 = vector.broadcast %29 : vector<16x1xf32> to vector<16x256xf32>
      %32 = arith.subf %23, %31 : vector<16x256xf32>
      %c0_16 = arith.constant 0 : index
      %c0_17 = arith.constant 0 : index
      %33 = vector.load %arg4[%c0_16, %c0_17] : memref<1x256xf32, #tpu.memory_space<vmem>>, vector<1x256xf32>
      %34 = vector.broadcast %33 : vector<1x256xf32> to vector<16x256xf32>
      %35 = arith.mulf %32, %34 : vector<16x256xf32>
      %36 = arith.mulf %35, %35 : vector<16x256xf32>
      %cst_18 = arith.constant dense<0.000000e+00> : vector<16xf32>
      %37 = vector.multi_reduction <add>, %36, %cst_18 [1] : vector<16x256xf32> to vector<16xf32>
      %38 = vector.shape_cast %37 : vector<16xf32> to vector<16x1xf32>
      %39 = arith.addf %30, %38 : vector<16x1xf32>
      %cst_19 = arith.constant 6.250000e-02 : f32
      %40 = vector.broadcast %cst_19 : f32 to vector<16x1xf32>
      %41 = arith.mulf %39, %40 : vector<16x1xf32>
      %c0_20 = arith.constant 0 : index
      %c0_21 = arith.constant 0 : index
      %42 = vector.load %arg5[%c0_20, %c0_21] : memref<16x1xf32, #tpu.memory_space<vmem>>, vector<16x1xf32>
      %cst_22 = arith.constant 9.99999974E-6 : f32
      %43 = vector.broadcast %cst_22 : f32 to vector<16x1xf32>
      %44 = arith.addf %41, %43 : vector<16x1xf32>
      %45 = math.rsqrt %44 : vector<16x1xf32>
      %46 = arith.mulf %42, %45 : vector<16x1xf32>
      %c0_23 = arith.constant 0 : index
      %c0_24 = arith.constant 0 : index
      %47 = vector.load %arg6[%c0_23, %c0_24] : memref<16x1xf32, #tpu.memory_space<vmem>>, vector<16x1xf32>
      %48 = arith.mulf %29, %46 : vector<16x1xf32>
      %49 = arith.subf %47, %48 : vector<16x1xf32>
      %50 = vector.broadcast %46 : vector<16x1xf32> to vector<16x256xf32>
      %51 = arith.mulf %23, %50 : vector<16x256xf32>
      %52 = vector.broadcast %49 : vector<16x1xf32> to vector<16x256xf32>
      %53 = arith.addf %51, %52 : vector<16x256xf32>
      %cst_25 = arith.constant 0.000000e+00 : f32
      %54 = vector.broadcast %cst_25 : f32 to vector<16x256xf32>
      %55 = arith.maximumf %53, %54 : vector<16x256xf32>
      %c0_26 = arith.constant 0 : index
      %c0_27 = arith.constant 0 : index
      %56 = vector.load %arg7[%c0_26, %c0_27] : memref<16x256xf32, #tpu.memory_space<vmem>>, vector<16x256xf32>
      tpu.vector_store %arg7[%c0_26, %c0_27], %55 {strides = array<i32>} : memref<16x256xf32, #tpu.memory_space<vmem>>, vector<16x256xf32>,
    } else {
    }
    return
  }
  func.func @transform_0(%arg0: i32) -> (i32, i32) {
    %c0_i32 = arith.constant 0 : i32
    %c0_i32_0 = arith.constant 0 : i32
    %c0_i32_1 = arith.constant 0 : i32
    return %c0_i32, %c0_i32_0 : i32, i32
  }
  func.func @transform_1(%arg0: i32) -> (i32, i32, i32) {
    %c0_i32 = arith.constant 0 : i32
    %c0_i32_0 = arith.constant 0 : i32
    %c0_i32_1 = arith.constant 0 : i32
    return %c0_i32, %c0_i32_0, %arg0 : i32, i32, i32
  }
  func.func @transform_2(%arg0: i32) -> (i32, i32, i32) {
    %c1_i32 = arith.constant 1 : i32
    %0 = arith.addi %arg0, %c1_i32 : i32
    %c2_i32 = arith.constant 2 : i32
    %1 = arith.muli %0, %c2_i32 : i32
    %c0_i32 = arith.constant 0 : i32
    %c0_i32_0 = arith.constant 0 : i32
    %c0_i32_1 = arith.constant 0 : i32
    return %c0_i32, %c0_i32_0, %1 : i32, i32, i32
  }
  func.func @transform_3(%arg0: i32) -> (i32, i32) {
    %c0_i32 = arith.constant 0 : i32
    %c0_i32_0 = arith.constant 0 : i32
    %c0_i32_1 = arith.constant 0 : i32
    return %c0_i32, %c0_i32_0 : i32, i32
  }
  func.func @transform_4(%arg0: i32) -> (i32, i32) {
    %c0_i32 = arith.constant 0 : i32
    %c0_i32_0 = arith.constant 0 : i32
    %c0_i32_1 = arith.constant 0 : i32
    return %c0_i32, %c0_i32_0 : i32, i32
  }
  func.func @transform_5(%arg0: i32) -> (i32, i32) {
    %c0_i32 = arith.constant 0 : i32
    %c0_i32_0 = arith.constant 0 : i32
    %c0_i32_1 = arith.constant 0 : i32
    return %c0_i32, %c0_i32_0 : i32, i32
  }
  func.func @transform_6(%arg0: i32) -> (i32, i32) {
    %c0_i32 = arith.constant 0 : i32
    %c0_i32_0 = arith.constant 0 : i32
    %c0_i32_1 = arith.constant 0 : i32
    return %c0_i32, %c0_i32_0 : i32, i32
  }
}

</mosaic_0001>

<bundles_post_ra>
// kernel: conv_or_deconv_block.3
= control target key start
LH: loop header
LB: loop body
LE: loop exit
PB: predicated region body
PF: predicated region fallthrough
CT: control target
= control target key end

     0   :  { %s294_s25 = smov 126   ;;  %s295_s26 = smov 127   ;;  %vm72_vm0 = vcmask 1031168   ;;  %vm63_vm1 = vcmask 1039360   ;;  %vm75_vm2 = vcmask 1043456   ;;  %vm91_vm3 = vcmask 195584   ;;  %s391_s2 = inlined_call_operand.vmem [shape: bf16[1,8,384], index: 2, kind: input, shape index: {}, may-alias: {1,2}]   ;;  %s392_s1 = inlined_call_operand.vmem [shape: bf16[1,8,384], index: 1, kind: input, shape index: {}, may-alias: {1,2}]   ;;  %s393_s0 = inlined_call_operand.vmem [shape: bf16[16,24], index: 0, kind: input, shape index: {}]   ;;  %s394_s3 = inlined_call_operand.vmem [shape: f32[1,256], index: 3, kind: input, shape index: {}]   ;;  %s395_s4 = inlined_call_operand.vmem [shape: f32[16,1], index: 4, kind: input, shape index: {}]   ;;  %s396_s5 = inlined_call_operand.vmem [shape: f32[16,1], index: 5, kind: input, shape index: {}]   ;;  %s397_s6 = inlined_call_operand.vmem [shape: f32[16,256], index: 6, kind: output, shape index: {}]  }
   0x1   :  { %v276_v0 = vld [vmem:[%s391_s2 + $0x8] sm:$0xf]  ;;  %v46_v1 = vld [vmem:[%s392_s1] sm:$0xff]  ;;  %v296_v58 = vmov 0  }
   0x2   :  { %70 = vrot.lane.b32.xlu1 %v276_v0, %s294_s25  ;;  %v49_v2 = vunpack.c.l.b16 %v46_v1  ;;  %v50_v3 = vunpack.c.h.b16 %v46_v1  ;;  %v56_v8 = vrot.slane %v276_v0, 4  ;;  %v283_v23 = vld [vmem:[%s393_s0] sm:$0xff]  ;;  %287 = vset.pattern.permute.xlu0 %v296_v58 }
   0x3   :  { %v133_v24 = vld [vmem:[%s394_s3] sm:$0x3]  ;;  %289 = vset.pattern.permute.xlu2 %v296_v58  ;;  %288 = vset.pattern.permute.xlu1 %v296_v58 }
   0x4   :  { %v51_v4 = vpack.c.b16 %v49_v2, %v49_v2  ;;  %v52_v5 = vpack.c.b16 %v50_v3, %v50_v3  ;;  %v135_v25 = vperm.slane %v133_v24, 0  ;;  %v136_v26 = vperm.slane %v133_v24, 1  ;;  %v171_v37 = vld [vmem:[%s394_s3] sm:$0x3] }
   0x5   :  { %v173_v40 = vperm.slane %v171_v37, 0  ;;  %v174_v41 = vperm.slane %v171_v37, 1 }
   0x6   :  { %66 = vrot.lane.b32.xlu0 %v51_v4, %s294_s25  ;;  %v54_v6 = vrot.slane %v51_v4, 4  ;;  %v55_v7 = vrot.slane %v52_v5, 4 }
   0x8   :  { %59 = vrot.lane.b32.xlu2 %v55_v7, %s295_s26 }
   0xa   :  { %57 = vrot.lane.b32.xlu1 %v54_v6, %s295_s26 }
   0xe   :  { %68 = vrot.lane.b32.xlu0 %v52_v5, %s294_s25 }
  0x10   :  { %61 = vrot.lane.b32.xlu2 %v56_v8, %s295_s26  ;;  %v195_v8 = vld [vmem:[%s395_s4] sm:$0xff] }
  0x62   :  { %v60_v9 = vpop.permute.xlu2 %59 }
  0x6a   :  { %v62_v12 = vpop.permute.xlu2 %61 }
  0x6b   :  { %v65_v19 = vsel %vm63_vm1, %v60_v9, %v62_v12 }
  0x6c   :  { %v82_v22 = vsel %vm75_vm2, %v52_v5, %v65_v19 }
  0x74   :  { %v71_v10 = vpop.permute.xlu1 %70 }
  0x78   :  { %v67_v11 = vpop.permute.xlu0 %66 }
  0x7c   :  { %v58_v13 = vpop.permute.xlu1 %57 }
  0x7d   :  { %v64_v20 = vsel %vm63_vm1, %v58_v13, %v60_v9 }
  0x7e   :  { %v78_v21 = vsel %vm75_vm2, %v51_v4, %v64_v20 }
  0x80   :  { %v69_v14 = vpop.permute.xlu0 %68 }
  0x81   :  { %v73_v15 = vsel %vm72_vm0, %v67_v11, %v69_v14  ;;  %v74_v16 = vsel %vm72_vm0, %v69_v14, %v71_v10  ;;  %v221_v14 = vld [vmem:[%s396_s5] sm:$0xff] }
  0x82   :  { %v96_v17 = vsel %vm75_vm2, %v73_v15, 0  ;;  %v99_v18 = vsel %vm75_vm2, %v74_v16, 0 }
  0x83   :  { %107 = vmatpush.bf16.msra.mxu0 %v96_v17  ;;  %121 = vmatpush.bf16.msra.mxu1 %v99_v18  ;;  %v196_v18 = vld [vmem:[%s395_s4 + $0x8] sm:$0xff] }
  0x87   :  { %108 = vmatpush.bf16.msra.mxu0 %v78_v21  ;;  %122 = vmatpush.bf16.msra.mxu1 %v82_v22 }
  0x8a   :  { %281 = vmatmul.msk.bf16.vlgmr.msra.gmra.mxu0 %vm91_vm3, %v283_v23  ;;  %282 = vmatmul.msk.bf16.vlgmr.msra.gmra.mxu1 %vm91_vm3, %v283_v23  ;;  %v222_v23 = vld [vmem:[%s396_s5 + $0x8] sm:$0xff] }
 0x107   :  { %v110_v27 = vpop.f32.mrf.mxu0  ;;  %v124_v28 = vpop.f32.mrf.mxu1 }
 0x108   :  { %v344_v29 = vmul.f32 %v135_v25, %v110_v27  ;;  %v346_v30 = vmul.f32 %v136_v26, %v124_v28 }
 0x10a   :  { %v157_v31 = vadd.f32 %v346_v30, %v344_v29 }
 0x10c   :  { %158 = vadd.xlane.f32.xlu0 %v157_v31 }
 0x10f   :  { %v112_v32 = vpop.f32.mrf.mxu0  ;;  %v126_v33 = vpop.f32.mrf.mxu1 }
 0x110   :  { %v350_v34 = vmul.f32 %v135_v25, %v112_v32  ;;  %v352_v35 = vmul.f32 %v136_v26, %v126_v33 }
 0x112   :  { %v160_v36 = vadd.f32 %v352_v35, %v350_v34 }
 0x114   :  { %161 = vadd.xlane.f32.xlu1 %v160_v36 }
 0x17f   :  { %v159_v38 = vpop.xlane.xlu0 %158 }
 0x180   :  { %v165_v39 = vmul.f32 0.0625, %v159_v38 }
 0x182   :  { %v167_v42 = vsub.f32 %v344_v29, %v165_v39  ;;  %v168_v43 = vsub.f32 %v346_v30, %v165_v39 }
 0x184   :  { %v177_v44 = vmul.f32 %v173_v40, %v167_v42  ;;  %v178_v45 = vmul.f32 %v174_v41, %v168_v43 }
 0x186   :  { %v181_v46 = vmul.f32 %v177_v44, %v177_v44  ;;  %v182_v47 = vmul.f32 %v178_v45, %v178_v45 }
 0x187   :  { %v162_v48 = vpop.xlane.xlu1 %161 }
 0x188   :  { %v166_v49 = vmul.f32 0.0625, %v162_v48  ;;  %v185_v50 = vadd.f32 %v182_v47, %v181_v46 }
 0x18a   :  { %v169_v51 = vsub.f32 %v350_v34, %v166_v49  ;;  %v170_v52 = vsub.f32 %v352_v35, %v166_v49  ;;  %186 = vadd.xlane.f32.xlu2 %v185_v50 }
 0x18c   :  { %v179_v53 = vmul.f32 %v173_v40, %v169_v51  ;;  %v180_v54 = vmul.f32 %v174_v41, %v170_v52 }
 0x18e   :  { %v183_v55 = vmul.f32 %v179_v53, %v179_v53  ;;  %v184_v56 = vmul.f32 %v180_v54, %v180_v54 }
 0x190   :  { %v188_v57 = vadd.f32 %v184_v56, %v183_v55 }
 0x192   :  { %189 = vadd.xlane.f32.xlu2 %v188_v57 }
 0x1fd   :  { %v187_v59 = vpop.xlane.xlu2 %186 }
 0x1fe   :  { %v193_v60 = vmul.f32 0.0625, %v187_v59 }
 0x200   :  { %v197_v61 = vadd.f32 1e-05, %v193_v60 }
 0x202   :  { %290 = vrsqrt.f32 %v197_v61  ;;  %vm205_vm5 = vweird.f32 %v197_v61 }
 0x205   :  { %v190_v62 = vpop.xlane.xlu2 %189 }
 0x206   :  { %v194_v63 = vmul.f32 0.0625, %v190_v62 }
 0x208   :  { %v291_v0 = vpop.eup %290  ;;  %v198_v1 = vadd.f32 1e-05, %v194_v63 }
 0x209   :  { %v200_v2 = vmul.f32 %v291_v0, %v197_v61  ;;  %vm206_vm4 = vweird.f32 %v291_v0 }
 0x20a   :  { %292 = vrsqrt.f32 %v198_v1  ;;  %vm207_vm6 = vmor %vm205_vm5, %vm206_vm4  ;;  %vm215_vm8 = vweird.f32 %v198_v1 }
 0x20b   :  { %v201_v3 = vmul.f32 %v291_v0, %v200_v2 }
 0x20d   :  { %v202_v4 = vmul.f32 0.5, %v201_v3 }
 0x20f   :  { %v203_v5 = vsub.f32 1.5, %v202_v4 }
 0x210   :  { %v293_v6 = vpop.eup %292 }
 0x211   :  { %v210_v7 = vmul.f32 %v293_v6, %v198_v1  ;;  %v204_v9 = vmul.f32 %v291_v0, %v203_v5  ;;  %vm216_vm7 = vweird.f32 %v293_v6 }
 0x212   :  { %vm217_vm9 = vmor %vm215_vm8, %vm216_vm7 }
 0x213   :  { %v211_v10 = vmul.f32 %v293_v6, %v210_v7  ;;  %v208_v11 = vsel %vm207_vm6, %v291_v0, %v204_v9 }
 0x214   :  { %v219_v12 = vmul.f32 %v208_v11, %v195_v8 }
 0x215   :  { %v212_v13 = vmul.f32 0.5, %v211_v10 }
 0x216   :  { %229 = vperm.xlu0 %287, %v219_v12   ;;  %v223_v15 = vmul.f32 %v219_v12, %v165_v39 }
 0x217   :  { %v213_v16 = vsub.f32 1.5, %v212_v13 }
 0x218   :  { %v225_v17 = vsub.f32 %v221_v14, %v223_v15 }
 0x219   :  { %v214_v19 = vmul.f32 %v293_v6, %v213_v16 }
 0x21a   :  { %243 = vperm.xlu2 %289, %v225_v17  }
 0x21b   :  { %v218_v20 = vsel %vm217_vm9, %v293_v6, %v214_v19 }
 0x21c   :  { %v220_v21 = vmul.f32 %v218_v20, %v196_v18 }
 0x21e   :  { %234 = vperm.xlu1 %288, %v220_v21   ;;  %v224_v22 = vmul.f32 %v220_v21, %v166_v49 }
 0x220   :  { %v226_v24 = vsub.f32 %v222_v23, %v224_v22 }
 0x226   :  { %248 = vperm.xlu1 %288, %v226_v24  }
 0x274   :  { %v244_v28 = vpop.permute.xlu2 %243 }
 0x288   :  { %v230_v25 = vpop.permute.xlu0 %229 }
 0x289   :  { %v237_v26 = vmul.f32 %v230_v25, %v344_v29  ;;  %v238_v27 = vmul.f32 %v230_v25, %v346_v30 }
 0x28b   :  { %v251_v31 = vadd.f32 %v244_v28, %v237_v26  ;;  %v252_v32 = vadd.f32 %v244_v28, %v238_v27 }
 0x28d   :  { %v255_v33 = vmax.f32 %v251_v31, 0.0  ;;  %v256_v36 = vmax.f32 %v252_v32, 0.0 }
 0x28f   :  { %259 = vst [vmem:[%s397_s6] sm:$0xff] %v255_v33 }
 0x290   :  { %260 = vst [vmem:[%s397_s6 + $0x8] sm:$0xff] %v256_v36  ;;  %v235_v37 = vpop.permute.xlu1 %234 }
 0x291   :  { %v239_v38 = vmul.f32 %v235_v37, %v350_v34  ;;  %v240_v29 = vmul.f32 %v235_v37, %v352_v35 }
 0x298   :  { %v249_v39 = vpop.permute.xlu1 %248 }
 0x299   :  { %v253_v30 = vadd.f32 %v249_v39, %v239_v38  ;;  %v254_v40 = vadd.f32 %v249_v39, %v240_v29 }
 0x29b   :  { %v257_v41 = vmax.f32 %v253_v30, 0.0  ;;  %v258_v42 = vmax.f32 %v254_v40, 0.0 }
 0x29d   :  { %261 = vst [vmem:[%s397_s6 + $0x10] sm:$0xff] %v257_v41 }
 0x29e   :  { %262 = vst [vmem:[%s397_s6 + $0x18] sm:$0xff] %v258_v42 }

// kernel: conv_or_deconv_block.2
= control target key start
LH: loop header
LB: loop body
LE: loop exit
PB: predicated region body
PF: predicated region fallthrough
CT: control target
= control target key end

     0   :  { %s328_s29 = smov 126   ;;  %s329_s30 = smov 127   ;;  %vm166_vm0 = vcmask 1031168   ;;  %vm169_vm1 = vcmask 1041408   ;;  %vm145_vm2 = vcmask 1039360   ;;  %vm174_vm3 = vcmask 1043456   ;;  %s404_s0 = inlined_call_operand.vmem [shape: bf16[8,20], index: 0, kind: input, shape index: {}]   ;;  %s405_s1 = inlined_call_operand.vmem [shape: bf16[2,4,384], index: 1, kind: input, shape index: {}, may-alias: {1,2}]   ;;  %s406_s2 = inlined_call_operand.vmem [shape: bf16[2,4,384], index: 2, kind: input, shape index: {}, may-alias: {1,2}]   ;;  %s407_s3 = inlined_call_operand.vmem [shape: f32[1,256], index: 3, kind: input, shape index: {}]   ;;  %s408_s4 = inlined_call_operand.vmem [shape: f32[8,1], index: 4, kind: input, shape index: {}]   ;;  %s409_s5 = inlined_call_operand.vmem [shape: f32[8,1], index: 5, kind: input, shape index: {}]   ;;  %s410_s6 = inlined_call_operand.vmem [shape: bf16[8,256], index: 6, kind: output, shape index: {}]  }
   0x1   :  { %v317_v0 = vld [vmem:[%s406_s2 + $0x4] sm:$0x3]  ;;  %v31_v1 = vld [vmem:[%s405_s1] sm:$0xf]  ;;  %v33_v2 = vld [vmem:[%s405_s1 + $0x6] sm:$0xf] }
   0x2   :  { %83 = vst [vmem:[#allocation4] sm:$0x3] %v317_v0  ;;  %v318_v3 = vld [vmem:[%s406_s2 + $0xa] sm:$0x3]  ;;  %vm179_vm4 = vcmask 1045504   ;;  %vm187_vm5 = vcmask 162816  }
   0x3   :  { %32 = vst [vmem:[#allocation3] sm:$0xf] %v31_v1  ;;  %v186_v39 = vld [vmem:[%s404_s0] sm:$0xf] }
   0x4   :  { %34 = vst [vmem:[#allocation3 + $0x4] sm:$0xf] %v33_v2  ;;  %v227_v44 = vld [vmem:[%s407_s3] sm:$0x3]  ;;  %v330_v2 = vmov 0  }
   0x5   :  { %85 = vst [vmem:[#allocation4 + $0x2] sm:$0x3] %v318_v3  ;;  %v230_v45 = vperm.slane %v227_v44, 1  ;;  %v229_v47 = vperm.slane %v227_v44, 0  ;;  %v252_v54 = vld [vmem:[%s407_s3] sm:$0x3]  ;;  %324 = vset.pattern.permute.xlu2 %v330_v2  ;;  %325 = vset.pattern.permute.xlu0 %v330_v2 }
   0x6   :  { %v254_v57 = vperm.slane %v252_v54, 0  ;;  %v255_v58 = vperm.slane %v252_v54, 1 }
   0x9   :  { %v118_v4 = vld [vmem:[#allocation4] sm:$0x3] }
   0xa   :  { %164 = vrot.lane.b32.xlu1 %v118_v4, %s328_s29  ;;  %v116_v5 = vld [vmem:[#allocation3] sm:$0xf]  ;;  %v138_v6 = vrot.slane %v118_v4, 4 }
   0xb   :  { %121 = vst [vmem:[#allocation1] ss:$4 sm:$0xff] %v116_v5  ;;  %v117_v7 = vld [vmem:[#allocation3 + $0x4] sm:$0xf] }
   0xc   :  { %128 = vst [vmem:[#allocation1 + $0x20] ss:$4 sm:$0xff] %v117_v7  ;;  %143 = vrot.lane.b32.xlu2 %v138_v6, %s329_s30  ;;  %v119_v13 = vld [vmem:[#allocation4 + $0x2] sm:$0x3] }
   0xd   :  { %v151_v15 = vrot.slane %v119_v13, 2 }
  0x12   :  { %v122_v8 = vld.sshfl [vmem:[#allocation1] sm:$0xff pattern:$0x73625140]  ;;  %v124_v9 = vld.sshfl [vmem:[#allocation1 + $0x8] sm:$0xff pattern:$0x73625140] }
  0x13   :  { %160 = vrot.lane.b32.xlu0 %v122_v8, %s328_s29  ;;  %v136_v10 = vrot.slane %v122_v8, 4  ;;  %v137_v11 = vrot.slane %v124_v9, 4  ;;  %v131_v12 = vld.sshfl [vmem:[#allocation1 + $0x28] sm:$0xff pattern:$0x73625140] }
  0x14   :  { %v150_v14 = vrot.slane %v131_v12, 2  ;;  %v129_v16 = vld.sshfl [vmem:[#allocation1 + $0x20] sm:$0xff pattern:$0x73625140]  ;;  %v134_v23 = vrot.slane %v131_v12, 6 }
  0x15   :  { %139 = vrot.lane.b32.xlu1 %v136_v10, %s329_s30  ;;  %141 = vrot.lane.b32.xlu2 %v137_v11, %s329_s30  ;;  %v149_v17 = vrot.slane %v129_v16, 2  ;;  %v133_v26 = vrot.slane %v129_v16, 6  ;;  %v267_v11 = vld [vmem:[%s408_s4] sm:$0xff] }
  0x16   :  { %v173_v29 = vsel %vm169_vm1, %v124_v9, %v134_v23  ;;  %v280_v16 = vld [vmem:[%s409_s5] sm:$0xff] }
  0x17   :  { %v171_v38 = vsel %vm169_vm1, %v122_v8, %v133_v26 }
  0x1b   :  { %162 = vrot.lane.b32.xlu0 %v124_v9, %s328_s29 }
  0x1d   :  { %154 = vrot.lane.b32.xlu1 %v150_v14, %s329_s30  ;;  %156 = vrot.lane.b32.xlu2 %v151_v15, %s329_s30 }
  0x23   :  { %152 = vrot.lane.b32.xlu0 %v149_v17, %s329_s30 }
  0x66   :  { %v144_v18 = vpop.permute.xlu2 %143 }
  0x6f   :  { %v142_v20 = vpop.permute.xlu2 %141 }
  0x70   :  { %v147_v30 = vsel %vm145_vm2, %v142_v20, %v144_v18 }
  0x71   :  { %v178_v35 = vsel %vm174_vm3, %v173_v29, %v147_v30 }
  0x77   :  { %v157_v25 = vpop.permute.xlu2 %156 }
  0x7c   :  { %v165_v19 = vpop.permute.xlu1 %164 }
  0x85   :  { %v161_v21 = vpop.permute.xlu0 %160 }
  0x87   :  { %v140_v22 = vpop.permute.xlu1 %139 }
  0x88   :  { %v146_v36 = vsel %vm145_vm2, %v140_v22, %v142_v20 }
  0x89   :  { %v176_v42 = vsel %vm174_vm3, %v171_v38, %v146_v36 }
  0x8d   :  { %v163_v24 = vpop.permute.xlu0 %162 }
  0x8e   :  { %v167_v27 = vsel %vm166_vm0, %v161_v21, %v163_v24  ;;  %v168_v28 = vsel %vm166_vm0, %v163_v24, %v165_v19 }
  0x8f   :  { %v155_v31 = vpop.permute.xlu1 %154  ;;  %v192_v32 = vsel %vm169_vm1, %v167_v27, 0  ;;  %v195_v33 = vsel %vm169_vm1, %v168_v28, 0 }
  0x90   :  { %v159_v34 = vsel %vm145_vm2, %v155_v31, %v157_v25  ;;  %203 = vmatpush.bf16.msra.mxu0 %v192_v32  ;;  %216 = vmatpush.bf16.msra.mxu1 %v195_v33 }
  0x91   :  { %v184_v37 = vsel %vm179_vm4, %v178_v35, %v159_v34 }
  0x94   :  { %217 = vmatpush.bf16.msra.mxu1 %v184_v37 }
  0x95   :  { %v153_v40 = vpop.permute.xlu0 %152 }
  0x96   :  { %v158_v41 = vsel %vm145_vm2, %v153_v40, %v155_v31 }
  0x97   :  { %320 = vmatmul.msk.bf16.vlgmr.msra.gmra.mxu1 %vm187_vm5, %v186_v39  ;;  %v181_v43 = vsel %vm179_vm4, %v176_v42, %v158_v41 }
  0x98   :  { %204 = vmatpush.bf16.msra.mxu0 %v181_v43 }
  0x9b   :  { %319 = vmatmul.msk.bf16.vlgmr.msra.gmra.mxu0 %vm187_vm5, %v186_v39 }
 0x114   :  { %v219_v46 = vpop.f32.mrf.mxu1 }
 0x115   :  { %v234_v48 = vmul.f32 %v230_v45, %v219_v46 }
 0x118   :  { %v206_v49 = vpop.f32.mrf.mxu0 }
 0x119   :  { %v233_v50 = vmul.f32 %v229_v47, %v206_v49 }
 0x11b   :  { %v245_v51 = vadd.f32 %v234_v48, %v233_v50 }
 0x11c   :  { %v221_v52 = vpop.f32.mrf.mxu1 }
 0x11d   :  { %246 = vadd.xlane.f32.xlu0 %v245_v51 }
 0x120   :  { %v208_v53 = vpop.f32.mrf.mxu0 }
 0x190   :  { %v247_v55 = vpop.xlane.xlu0 %246 }
 0x191   :  { %v249_v56 = vmul.f32 0.0625, %v247_v55 }
 0x193   :  { %v250_v59 = vsub.f32 %v233_v50, %v249_v56  ;;  %v251_v60 = vsub.f32 %v234_v48, %v249_v56 }
 0x195   :  { %v258_v61 = vmul.f32 %v254_v57, %v250_v59  ;;  %v259_v62 = vmul.f32 %v255_v58, %v251_v60 }
 0x197   :  { %v260_v63 = vmul.f32 %v258_v61, %v258_v61  ;;  %v261_v0 = vmul.f32 %v259_v62, %v259_v62 }
 0x199   :  { %v262_v1 = vadd.f32 %v261_v0, %v260_v63 }
 0x19b   :  { %263 = vadd.xlane.f32.xlu1 %v262_v1 }
 0x20e   :  { %v264_v3 = vpop.xlane.xlu1 %263 }
 0x20f   :  { %v266_v4 = vmul.f32 0.0625, %v264_v3 }
 0x211   :  { %v268_v5 = vadd.f32 1e-05, %v266_v4 }
 0x213   :  { %326 = vrsqrt.f32 %v268_v5  ;;  %vm275_vm7 = vweird.f32 %v268_v5 }
 0x219   :  { %v327_v6 = vpop.eup %326 }
 0x21a   :  { %v270_v7 = vmul.f32 %v327_v6, %v268_v5  ;;  %vm276_vm6 = vweird.f32 %v327_v6 }
 0x21b   :  { %vm277_vm8 = vmor %vm275_vm7, %vm276_vm6 }
 0x21c   :  { %v271_v8 = vmul.f32 %v327_v6, %v270_v7 }
 0x21e   :  { %v272_v9 = vmul.f32 0.5, %v271_v8 }
 0x220   :  { %v273_v10 = vsub.f32 1.5, %v272_v9 }
 0x222   :  { %v274_v12 = vmul.f32 %v327_v6, %v273_v10 }
 0x224   :  { %v278_v13 = vsel %vm277_vm8, %v327_v6, %v274_v12 }
 0x225   :  { %v279_v14 = vmul.f32 %v278_v13, %v267_v11 }
 0x227   :  { %285 = vperm.xlu2 %324, %v279_v14   ;;  %v281_v15 = vmul.f32 %v279_v14, %v249_v56 }
 0x229   :  { %v282_v17 = vsub.f32 %v280_v16, %v281_v15 }
 0x22f   :  { %292 = vperm.xlu2 %324, %v282_v17  }
 0x281   :  { %v286_v18 = vpop.permute.xlu2 %285 }
 0x282   :  { %v288_v19 = vmul.f32 %v286_v18, %v233_v50  ;;  %v289_v20 = vmul.f32 %v286_v18, %v234_v48 }
 0x289   :  { %v293_v21 = vpop.permute.xlu2 %292 }
 0x28a   :  { %v295_v22 = vadd.f32 %v293_v21, %v288_v19  ;;  %v296_v23 = vadd.f32 %v293_v21, %v289_v20 }
 0x28c   :  { %v297_v24 = vmax.f32 %v295_v22, 0.0  ;;  %v298_v25 = vmax.f32 %v296_v23, 0.0 }
 0x28e   :  { %v299_v26 = vpack.c.bf16 %v298_v25, %v297_v24 }
 0x290   :  { %300 = vst [vmem:[%s410_s6] sm:$0xff] %v299_v26 }

</bundles_post_ra>
